<compile_context>
chip_gen: v5e
topology: v5e:2x2
jax: 0.10.0
libtpu: 0.0.40
codegen_flags: <defaults>
</compile_context>

<pallas_src>
import functools

import jax
import jax.numpy as jnp
from jax.experimental import pallas as pl
from jax.experimental.pallas import tpu as pltpu

_LANES = 128
_ROW_ALIGN = 32          # int8 labels need (32,128) min tile
_DEFAULT_BLOCK_ROWS = 1024


def _round_up(x, m):
    return ((x + m - 1) // m) * m


def _cdiv(a, b):
    return (a + b - 1) // b


def _rank_loss_kernel(labels_ref, whole_ref, head_ref, body_ref, scene_ref,
                      out_ref,
                      max_th, max_tb, max_ts, min_fh, min_fb, min_fs,
                      *, alpha, block_rows, valid_rows, need_row_mask):
    neg_inf = jnp.float32(-jnp.inf)
    pos_inf = jnp.float32(jnp.inf)

    @pl.when(pl.program_id(0) == 0)
    def _init():
        max_th[...] = jnp.full_like(max_th, neg_inf)
        max_tb[...] = jnp.full_like(max_tb, neg_inf)
        max_ts[...] = jnp.full_like(max_ts, neg_inf)
        min_fh[...] = jnp.full_like(min_fh, pos_inf)
        min_fb[...] = jnp.full_like(min_fb, pos_inf)
        min_fs[...] = jnp.full_like(min_fs, pos_inf)

    lab = labels_ref[...].astype(jnp.int32)   # int8 in HBM; -1 marks padding
    is_true = lab > 0
    is_false = lab == 0
    if need_row_mask:
        # Last grid block may extend past the array; mask out-of-range rows.
        row_in_blk = jax.lax.broadcasted_iota(
            jnp.int32, (block_rows, _LANES), 0)
        lim = valid_rows - pl.program_id(0) * block_rows
        row_ok = row_in_blk < lim
        is_true = jnp.logical_and(is_true, row_ok)
        is_false = jnp.logical_and(is_false, row_ok)

    half = jnp.float32(0.5)
    # sigmoid(x) - sigmoid(w) = 0.5 * (tanh(x/2) - tanh(w/2)); the 0.5 is
    # applied to the six scalars in the finalize step.
    t_w = jnp.tanh(whole_ref[...].astype(jnp.float32) * half)
    t_h = jnp.tanh(head_ref[...].astype(jnp.float32) * half)
    t_b = jnp.tanh(body_ref[...].astype(jnp.float32) * half)
    t_s = jnp.tanh(scene_ref[...].astype(jnp.float32) * half)
    e_h = t_h - t_w
    e_b = t_b - t_w
    e_s = t_s - t_w

    g = block_rows // 8

    def upd_max(acc, mask, val):
        red = jnp.max(jnp.where(mask, val, neg_inf).reshape(g, 8, _LANES),
                      axis=0)                      # tile-aligned -> VPU vmax
        acc[...] = jnp.maximum(acc[...], red)

    def upd_min(acc, mask, val):
        red = jnp.min(jnp.where(mask, val, pos_inf).reshape(g, 8, _LANES),
                      axis=0)
        acc[...] = jnp.minimum(acc[...], red)

    upd_max(max_th, is_true, e_h)
    upd_max(max_tb, is_true, e_b)
    upd_max(max_ts, is_true, e_s)
    upd_min(min_fh, is_false, e_h)
    upd_min(min_fb, is_false, e_b)
    upd_min(min_fs, is_false, e_s)

    @pl.when(pl.program_id(0) == pl.num_programs(0) - 1)
    def _finalize():
        loss = (jnp.float32(6.0 * alpha)
                + jnp.float32(0.5)
                * (jnp.max(max_th[...]) + jnp.max(max_tb[...])
                   + jnp.max(max_ts[...])
                   - jnp.min(min_fh[...]) - jnp.min(min_fb[...])
                   - jnp.min(min_fs[...])))
        out_ref[...] = jnp.full((1, 1), loss, dtype=out_ref.dtype)


def rank_loss(out_list, labels, alpha=0.1, block_rows=None):
    """out_list: list of 4 arrays of shape (N,) (f32 or bf16); labels: (N,) 0/1."""
    n = labels.shape[0]
    rows = _cdiv(n, _LANES)                      # number of 128-lane rows

    if block_rows is None:
        block_rows = min(_DEFAULT_BLOCK_ROWS, _round_up(rows, _ROW_ALIGN))
    else:
        block_rows = _round_up(block_rows, _ROW_ALIGN)

    grid = max(1, _cdiv(rows, block_rows))
    # Pad only to one block when the input is smaller than a block; otherwise
    # pad only to the next multiple of 128 (zero-copy reshape if already
    # divisible) and let the in-kernel row mask cover the partial last block.
    arr_rows = max(rows, block_rows)
    need_row_mask = grid * block_rows > arr_rows
    pad_n = arr_rows * _LANES - n

    labels_p = labels.astype(jnp.int8)
    if pad_n:
        labels_p = jnp.pad(labels_p, (0, pad_n), constant_values=-1)
    labels_p = labels_p.reshape(arr_rows, _LANES)

    arrs = []
    for o in out_list:
        if pad_n:
            o = jnp.pad(o, (0, pad_n))
        arrs.append(o.reshape(arr_rows, _LANES))

    kernel = functools.partial(
        _rank_loss_kernel,
        alpha=float(alpha),
        block_rows=block_rows,
        valid_rows=rows,
        need_row_mask=need_row_mask,
    )

    out = pl.pallas_call(
        kernel,
        out_shape=jax.ShapeDtypeStruct((1, 1), jnp.float32),
        grid=(grid,),
        in_specs=[pl.BlockSpec((block_rows, _LANES), lambda i: (i, 0))] * 5,
        out_specs=pl.BlockSpec((1, 1), lambda i: (0, 0)),
        scratch_shapes=[pltpu.VMEM((8, _LANES), jnp.float32)] * 6,
        compiler_params=pltpu.CompilerParams(
            dimension_semantics=("arbitrary",)),
    )(labels_p, *arrs)
    return out[0, 0]


def rank_loss_ref(out_list, labels, alpha=0.1):
    """Pure-JAX reference (masked-max == boolean-index + max of PyTorch)."""
    lab = labels.astype(jnp.int32) > 0
    s_w, s_h, s_b, s_s = [jax.nn.sigmoid(o.astype(jnp.float32)) for o in out_list]
    neg_inf = -jnp.inf

    def mmax(mask, vals):
        return jnp.max(jnp.where(mask, vals, neg_inf))

    return (mmax(lab, alpha - (s_w - s_h)) +
            mmax(lab, alpha - (s_w - s_b)) +
            mmax(lab, alpha - (s_w - s_s)) +
            mmax(~lab, alpha - (s_h - s_w)) +
            mmax(~lab, alpha - (s_b - s_w)) +
            mmax(~lab, alpha - (s_s - s_w)))


def _check(n, labels, key, block_rows=None, alpha=0.1):
    ks = jax.random.split(key, 4)
    out_list = [jax.random.normal(k, (n,), dtype=jnp.float32) for k in ks]
    got = jax.block_until_ready(
        rank_loss(out_list, labels, alpha=alpha, block_rows=block_rows))
    ref = rank_loss_ref(out_list, labels, alpha=alpha)
    assert jnp.allclose(got, ref, atol=1e-5, rtol=1e-5), (n, block_rows, got, ref)


if __name__ == "__main__":
    key = jax.random.PRNGKey(0)
    k1, k2, k3, k4 = jax.random.split(key, 4)

    # --- small demo case (batch of 8 samples), matches the module's usage ---
    labels_small = jnp.array([1, 0, 1, 1, 0, 0, 1, 0], dtype=jnp.int32)
    _check(8, labels_small, k1)

    # --- padding within last row + multi-step grid + partial last block -----
    n2 = 12837                                    # rows=101, grid=4 at br=32
    labels2 = (jnp.arange(n2) % 3 == 0).astype(jnp.int32)
    _check(n2, labels2, k2, block_rows=32)

    # --- exactly divisible: zero-copy reshape path, multi-step grid ---------
    n3 = 8192                                     # rows=64, grid=2 at br=32
    labels3 = (jnp.arange(n3) % 2 == 0).astype(jnp.int32)
    _check(n3, labels3, k3, block_rows=32)

    # --- default block_rows (1024) with grid=2 and a 1-row last block -------
    n4 = 131149                                   # rows=1025
    labels4 = (jnp.arange(n4) % 5 == 0).astype(jnp.int32)
    _check(n4, labels4, k4)

    print("KERNEL_OK")
</pallas_src>

<mosaic_0001>
module attributes {stable_mosaic.version = 11 : i64} {
  func.func @_rank_loss_kernel(%arg0: i32, %arg1: memref<32x128xi8, #tpu.memory_space<vmem>>, %arg2: memref<32x128xf32, #tpu.memory_space<vmem>>, %arg3: memref<32x128xf32, #tpu.memory_space<vmem>>, %arg4: memref<32x128xf32, #tpu.memory_space<vmem>>, %arg5: memref<32x128xf32, #tpu.memory_space<vmem>>, %arg6: memref<1x1xf32, #tpu.memory_space<vmem>>, %arg7: memref<8x128xf32, #tpu.memory_space<vmem>>, %arg8: memref<8x128xf32, #tpu.memory_space<vmem>>, %arg9: memref<8x128xf32, #tpu.memory_space<vmem>>, %arg10: memref<8x128xf32, #tpu.memory_space<vmem>>, %arg11: memref<8x128xf32, #tpu.memory_space<vmem>>, %arg12: memref<8x128xf32, #tpu.memory_space<vmem>>) attributes {dimension_semantics = [#tpu.dimension_semantics<arbitrary>], iteration_bounds = array<i64: 1>, scalar_prefetch = 0 : i64, scratch_operands = 6 : i64, tpu.core_type = #tpu.core_type<tc>, window_params = [{transform_indices = @transform_0, window_bounds = array<i64: 32, 128>}, {transform_indices = @transform_1, window_bounds = array<i64: 32, 128>}, {transform_indices = @transform_2, window_bounds = array<i64: 32, 128>}, {transform_indices = @transform_3, window_bounds = array<i64: 32, 128>}, {transform_indices = @transform_4, window_bounds = array<i64: 32, 128>}, {pipeline_mode = #tpu.pipeline_mode<synchronous>, transform_indices = @transform_5, window_bounds = array<i64: 1, 1>}]} {
    %c0_i32 = arith.constant 0 : i32
    %0 = arith.cmpi eq, %arg0, %c0_i32 : i32
    %1 = arith.extui %0 : i1 to i32
    %cst = arith.constant 0xFF800000 : f32
    %cst_0 = arith.constant 0x7F800000 : f32
    %c0_i32_1 = arith.constant 0 : i32
    %2 = arith.cmpi ne, %1, %c0_i32_1 : i32
    scf.if %2 {
      %73 = vector.broadcast %cst : f32 to vector<8x128xf32>
      %c0_55 = arith.constant 0 : index
      %c0_56 = arith.constant 0 : index
      %74 = vector.load %arg7[%c0_55, %c0_56] : memref<8x128xf32, #tpu.memory_space<vmem>>, vector<8x128xf32>
      tpu.vector_store %arg7[%c0_55, %c0_56], %73 {strides = array<i32>} : memref<8x128xf32, #tpu.memory_space<vmem>>, vector<8x128xf32>,
      %75 = vector.broadcast %cst : f32 to vector<8x128xf32>
      %c0_57 = arith.constant 0 : index
      %c0_58 = arith.constant 0 : index
      %76 = vector.load %arg8[%c0_57, %c0_58] : memref<8x128xf32, #tpu.memory_space<vmem>>, vector<8x128xf32>
      tpu.vector_store %arg8[%c0_57, %c0_58], %75 {strides = array<i32>} : memref<8x128xf32, #tpu.memory_space<vmem>>, vector<8x128xf32>,
      %77 = vector.broadcast %cst : f32 to vector<8x128xf32>
      %c0_59 = arith.constant 0 : index
      %c0_60 = arith.constant 0 : index
      %78 = vector.load %arg9[%c0_59, %c0_60] : memref<8x128xf32, #tpu.memory_space<vmem>>, vector<8x128xf32>
      tpu.vector_store %arg9[%c0_59, %c0_60], %77 {strides = array<i32>} : memref<8x128xf32, #tpu.memory_space<vmem>>, vector<8x128xf32>,
      %79 = vector.broadcast %cst_0 : f32 to vector<8x128xf32>
      %c0_61 = arith.constant 0 : index
      %c0_62 = arith.constant 0 : index
      %80 = vector.load %arg10[%c0_61, %c0_62] : memref<8x128xf32, #tpu.memory_space<vmem>>, vector<8x128xf32>
      tpu.vector_store %arg10[%c0_61, %c0_62], %79 {strides = array<i32>} : memref<8x128xf32, #tpu.memory_space<vmem>>, vector<8x128xf32>,
      %81 = vector.broadcast %cst_0 : f32 to vector<8x128xf32>
      %c0_63 = arith.constant 0 : index
      %c0_64 = arith.constant 0 : index
      %82 = vector.load %arg11[%c0_63, %c0_64] : memref<8x128xf32, #tpu.memory_space<vmem>>, vector<8x128xf32>
      tpu.vector_store %arg11[%c0_63, %c0_64], %81 {strides = array<i32>} : memref<8x128xf32, #tpu.memory_space<vmem>>, vector<8x128xf32>,
      %83 = vector.broadcast %cst_0 : f32 to vector<8x128xf32>
      %c0_65 = arith.constant 0 : index
      %c0_66 = arith.constant 0 : index
      %84 = vector.load %arg12[%c0_65, %c0_66] : memref<8x128xf32, #tpu.memory_space<vmem>>, vector<8x128xf32>
      tpu.vector_store %arg12[%c0_65, %c0_66], %83 {strides = array<i32>} : memref<8x128xf32, #tpu.memory_space<vmem>>, vector<8x128xf32>,
    } else {
    }
    %c0 = arith.constant 0 : index
    %c0_2 = arith.constant 0 : index
    %3 = vector.load %arg1[%c0, %c0_2] : memref<32x128xi8, #tpu.memory_space<vmem>>, vector<32x128xi8>
    %4 = arith.extsi %3 : vector<32x128xi8> to vector<32x128xi32>
    %c0_i32_3 = arith.constant 0 : i32
    %5 = vector.broadcast %c0_i32_3 : i32 to vector<32x128xi32>
    %6 = arith.cmpi sgt, %4, %5 : vector<32x128xi32>
    %c0_i32_4 = arith.constant 0 : i32
    %7 = vector.broadcast %c0_i32_4 : i32 to vector<32x128xi32>
    %8 = arith.cmpi eq, %4, %7 : vector<32x128xi32>
    %c0_5 = arith.constant 0 : index
    %c0_6 = arith.constant 0 : index
    %9 = vector.load %arg2[%c0_5, %c0_6] : memref<32x128xf32, #tpu.memory_space<vmem>>, vector<32x128xf32>
    %cst_7 = arith.constant 5.000000e-01 : f32
    %10 = vector.broadcast %cst_7 : f32 to vector<32x128xf32>
    %11 = arith.mulf %9, %10 : vector<32x128xf32>
    %12 = math.tanh %11 : vector<32x128xf32>
    %c0_8 = arith.constant 0 : index
    %c0_9 = arith.constant 0 : index
    %13 = vector.load %arg3[%c0_8, %c0_9] : memref<32x128xf32, #tpu.memory_space<vmem>>, vector<32x128xf32>
    %cst_10 = arith.constant 5.000000e-01 : f32
    %14 = vector.broadcast %cst_10 : f32 to vector<32x128xf32>
    %15 = arith.mulf %13, %14 : vector<32x128xf32>
    %16 = math.tanh %15 : vector<32x128xf32>
    %c0_11 = arith.constant 0 : index
    %c0_12 = arith.constant 0 : index
    %17 = vector.load %arg4[%c0_11, %c0_12] : memref<32x128xf32, #tpu.memory_space<vmem>>, vector<32x128xf32>
    %cst_13 = arith.constant 5.000000e-01 : f32
    %18 = vector.broadcast %cst_13 : f32 to vector<32x128xf32>
    %19 = arith.mulf %17, %18 : vector<32x128xf32>
    %20 = math.tanh %19 : vector<32x128xf32>
    %c0_14 = arith.constant 0 : index
    %c0_15 = arith.constant 0 : index
    %21 = vector.load %arg5[%c0_14, %c0_15] : memref<32x128xf32, #tpu.memory_space<vmem>>, vector<32x128xf32>
    %cst_16 = arith.constant 5.000000e-01 : f32
    %22 = vector.broadcast %cst_16 : f32 to vector<32x128xf32>
    %23 = arith.mulf %21, %22 : vector<32x128xf32>
    %24 = math.tanh %23 : vector<32x128xf32>
    %25 = arith.subf %16, %12 : vector<32x128xf32>
    %26 = arith.subf %20, %12 : vector<32x128xf32>
    %27 = arith.subf %24, %12 : vector<32x128xf32>
    %cst_17 = arith.constant 0xFF800000 : f32
    %28 = vector.broadcast %cst_17 : f32 to vector<32x128xf32>
    %29 = arith.select %6, %25, %28 : vector<32x128xi1>, vector<32x128xf32>
    %30 = vector.shape_cast %29 : vector<32x128xf32> to vector<4x8x128xf32>
    %cst_18 = arith.constant dense<0xFF800000> : vector<8x128xf32>
    %31 = vector.multi_reduction <maximumf>, %30, %cst_18 [0] : vector<4x8x128xf32> to vector<8x128xf32>
    %c0_19 = arith.constant 0 : index
    %c0_20 = arith.constant 0 : index
    %32 = vector.load %arg7[%c0_19, %c0_20] : memref<8x128xf32, #tpu.memory_space<vmem>>, vector<8x128xf32>
    %33 = arith.maximumf %32, %31 : vector<8x128xf32>
    %c0_21 = arith.constant 0 : index
    %c0_22 = arith.constant 0 : index
    %34 = vector.load %arg7[%c0_21, %c0_22] : memref<8x128xf32, #tpu.memory_space<vmem>>, vector<8x128xf32>
    tpu.vector_store %arg7[%c0_21, %c0_22], %33 {strides = array<i32>} : memref<8x128xf32, #tpu.memory_space<vmem>>, vector<8x128xf32>,
    %cst_23 = arith.constant 0xFF800000 : f32
    %35 = vector.broadcast %cst_23 : f32 to vector<32x128xf32>
    %36 = arith.select %6, %26, %35 : vector<32x128xi1>, vector<32x128xf32>
    %37 = vector.shape_cast %36 : vector<32x128xf32> to vector<4x8x128xf32>
    %cst_24 = arith.constant dense<0xFF800000> : vector<8x128xf32>
    %38 = vector.multi_reduction <maximumf>, %37, %cst_24 [0] : vector<4x8x128xf32> to vector<8x128xf32>
    %c0_25 = arith.constant 0 : index
    %c0_26 = arith.constant 0 : index
    %39 = vector.load %arg8[%c0_25, %c0_26] : memref<8x128xf32, #tpu.memory_space<vmem>>, vector<8x128xf32>
    %40 = arith.maximumf %39, %38 : vector<8x128xf32>
    %c0_27 = arith.constant 0 : index
    %c0_28 = arith.constant 0 : index
    %41 = vector.load %arg8[%c0_27, %c0_28] : memref<8x128xf32, #tpu.memory_space<vmem>>, vector<8x128xf32>
    tpu.vector_store %arg8[%c0_27, %c0_28], %40 {strides = array<i32>} : memref<8x128xf32, #tpu.memory_space<vmem>>, vector<8x128xf32>,
    %cst_29 = arith.constant 0xFF800000 : f32
    %42 = vector.broadcast %cst_29 : f32 to vector<32x128xf32>
    %43 = arith.select %6, %27, %42 : vector<32x128xi1>, vector<32x128xf32>
    %44 = vector.shape_cast %43 : vector<32x128xf32> to vector<4x8x128xf32>
    %cst_30 = arith.constant dense<0xFF800000> : vector<8x128xf32>
    %45 = vector.multi_reduction <maximumf>, %44, %cst_30 [0] : vector<4x8x128xf32> to vector<8x128xf32>
    %c0_31 = arith.constant 0 : index
    %c0_32 = arith.constant 0 : index
    %46 = vector.load %arg9[%c0_31, %c0_32] : memref<8x128xf32, #tpu.memory_space<vmem>>, vector<8x128xf32>
    %47 = arith.maximumf %46, %45 : vector<8x128xf32>
    %c0_33 = arith.constant 0 : index
    %c0_34 = arith.constant 0 : index
    %48 = vector.load %arg9[%c0_33, %c0_34] : memref<8x128xf32, #tpu.memory_space<vmem>>, vector<8x128xf32>
    tpu.vector_store %arg9[%c0_33, %c0_34], %47 {strides = array<i32>} : memref<8x128xf32, #tpu.memory_space<vmem>>, vector<8x128xf32>,
    %cst_35 = arith.constant 0x7F800000 : f32
    %49 = vector.broadcast %cst_35 : f32 to vector<32x128xf32>
    %50 = arith.select %8, %25, %49 : vector<32x128xi1>, vector<32x128xf32>
    %51 = vector.shape_cast %50 : vector<32x128xf32> to vector<4x8x128xf32>
    %cst_36 = arith.constant dense<0x7F800000> : vector<8x128xf32>
    %52 = vector.multi_reduction <minimumf>, %51, %cst_36 [0] : vector<4x8x128xf32> to vector<8x128xf32>
    %c0_37 = arith.constant 0 : index
    %c0_38 = arith.constant 0 : index
    %53 = vector.load %arg10[%c0_37, %c0_38] : memref<8x128xf32, #tpu.memory_space<vmem>>, vector<8x128xf32>
    %54 = arith.minimumf %53, %52 : vector<8x128xf32>
    %c0_39 = arith.constant 0 : index
    %c0_40 = arith.constant 0 : index
    %55 = vector.load %arg10[%c0_39, %c0_40] : memref<8x128xf32, #tpu.memory_space<vmem>>, vector<8x128xf32>
    tpu.vector_store %arg10[%c0_39, %c0_40], %54 {strides = array<i32>} : memref<8x128xf32, #tpu.memory_space<vmem>>, vector<8x128xf32>,
    %cst_41 = arith.constant 0x7F800000 : f32
    %56 = vector.broadcast %cst_41 : f32 to vector<32x128xf32>
    %57 = arith.select %8, %26, %56 : vector<32x128xi1>, vector<32x128xf32>
    %58 = vector.shape_cast %57 : vector<32x128xf32> to vector<4x8x128xf32>
    %cst_42 = arith.constant dense<0x7F800000> : vector<8x128xf32>
    %59 = vector.multi_reduction <minimumf>, %58, %cst_42 [0] : vector<4x8x128xf32> to vector<8x128xf32>
    %c0_43 = arith.constant 0 : index
    %c0_44 = arith.constant 0 : index
    %60 = vector.load %arg11[%c0_43, %c0_44] : memref<8x128xf32, #tpu.memory_space<vmem>>, vector<8x128xf32>
    %61 = arith.minimumf %60, %59 : vector<8x128xf32>
    %c0_45 = arith.constant 0 : index
    %c0_46 = arith.constant 0 : index
    %62 = vector.load %arg11[%c0_45, %c0_46] : memref<8x128xf32, #tpu.memory_space<vmem>>, vector<8x128xf32>
    tpu.vector_store %arg11[%c0_45, %c0_46], %61 {strides = array<i32>} : memref<8x128xf32, #tpu.memory_space<vmem>>, vector<8x128xf32>,
    %cst_47 = arith.constant 0x7F800000 : f32
    %63 = vector.broadcast %cst_47 : f32 to vector<32x128xf32>
    %64 = arith.select %8, %27, %63 : vector<32x128xi1>, vector<32x128xf32>
    %65 = vector.shape_cast %64 : vector<32x128xf32> to vector<4x8x128xf32>
    %cst_48 = arith.constant dense<0x7F800000> : vector<8x128xf32>
    %66 = vector.multi_reduction <minimumf>, %65, %cst_48 [0] : vector<4x8x128xf32> to vector<8x128xf32>
    %c0_49 = arith.constant 0 : index
    %c0_50 = arith.constant 0 : index
    %67 = vector.load %arg12[%c0_49, %c0_50] : memref<8x128xf32, #tpu.memory_space<vmem>>, vector<8x128xf32>
    %68 = arith.minimumf %67, %66 : vector<8x128xf32>
    %c0_51 = arith.constant 0 : index
    %c0_52 = arith.constant 0 : index
    %69 = vector.load %arg12[%c0_51, %c0_52] : memref<8x128xf32, #tpu.memory_space<vmem>>, vector<8x128xf32>
    tpu.vector_store %arg12[%c0_51, %c0_52], %68 {strides = array<i32>} : memref<8x128xf32, #tpu.memory_space<vmem>>, vector<8x128xf32>,
    %c0_i32_53 = arith.constant 0 : i32
    %70 = arith.cmpi eq, %arg0, %c0_i32_53 : i32
    %71 = arith.extui %70 : i1 to i32
    %c0_i32_54 = arith.constant 0 : i32
    %72 = arith.cmpi ne, %71, %c0_i32_54 : i32
    scf.if %72 {
      %c0_55 = arith.constant 0 : index
      %c0_56 = arith.constant 0 : index
      %73 = vector.load %arg7[%c0_55, %c0_56] : memref<8x128xf32, #tpu.memory_space<vmem>>, vector<8x128xf32>
      %74 = vector.shape_cast %73 : vector<8x128xf32> to vector<1x8x128xf32>
      %cst_57 = arith.constant dense<0xFF800000> : vector<1xf32>
      %75 = vector.multi_reduction <maximumf>, %74, %cst_57 [1, 2] : vector<1x8x128xf32> to vector<1xf32>
      %76 = vector.shape_cast %75 : vector<1xf32> to vector<1x1x1xf32>
      %77 = vector.extract %76[0, 0, 0] : f32 from vector<1x1x1xf32>
      %c0_58 = arith.constant 0 : index
      %c0_59 = arith.constant 0 : index
      %78 = vector.load %arg8[%c0_58, %c0_59] : memref<8x128xf32, #tpu.memory_space<vmem>>, vector<8x128xf32>
      %79 = vector.shape_cast %78 : vector<8x128xf32> to vector<1x8x128xf32>
      %cst_60 = arith.constant dense<0xFF800000> : vector<1xf32>
      %80 = vector.multi_reduction <maximumf>, %79, %cst_60 [1, 2] : vector<1x8x128xf32> to vector<1xf32>
      %81 = vector.shape_cast %80 : vector<1xf32> to vector<1x1x1xf32>
      %82 = vector.extract %81[0, 0, 0] : f32 from vector<1x1x1xf32>
      %83 = arith.addf %77, %82 : f32
      %c0_61 = arith.constant 0 : index
      %c0_62 = arith.constant 0 : index
      %84 = vector.load %arg9[%c0_61, %c0_62] : memref<8x128xf32, #tpu.memory_space<vmem>>, vector<8x128xf32>
      %85 = vector.shape_cast %84 : vector<8x128xf32> to vector<1x8x128xf32>
      %cst_63 = arith.constant dense<0xFF800000> : vector<1xf32>
      %86 = vector.multi_reduction <maximumf>, %85, %cst_63 [1, 2] : vector<1x8x128xf32> to vector<1xf32>
      %87 = vector.shape_cast %86 : vector<1xf32> to vector<1x1x1xf32>
      %88 = vector.extract %87[0, 0, 0] : f32 from vector<1x1x1xf32>
      %89 = arith.addf %83, %88 : f32
      %c0_64 = arith.constant 0 : index
      %c0_65 = arith.constant 0 : index
      %90 = vector.load %arg10[%c0_64, %c0_65] : memref<8x128xf32, #tpu.memory_space<vmem>>, vector<8x128xf32>
      %91 = vector.shape_cast %90 : vector<8x128xf32> to vector<1x8x128xf32>
      %cst_66 = arith.constant dense<0x7F800000> : vector<1xf32>
      %92 = vector.multi_reduction <minimumf>, %91, %cst_66 [1, 2] : vector<1x8x128xf32> to vector<1xf32>
      %93 = vector.shape_cast %92 : vector<1xf32> to vector<1x1x1xf32>
      %94 = vector.extract %93[0, 0, 0] : f32 from vector<1x1x1xf32>
      %95 = arith.subf %89, %94 : f32
      %c0_67 = arith.constant 0 : index
      %c0_68 = arith.constant 0 : index
      %96 = vector.load %arg11[%c0_67, %c0_68] : memref<8x128xf32, #tpu.memory_space<vmem>>, vector<8x128xf32>
      %97 = vector.shape_cast %96 : vector<8x128xf32> to vector<1x8x128xf32>
      %cst_69 = arith.constant dense<0x7F800000> : vector<1xf32>
      %98 = vector.multi_reduction <minimumf>, %97, %cst_69 [1, 2] : vector<1x8x128xf32> to vector<1xf32>
      %99 = vector.shape_cast %98 : vector<1xf32> to vector<1x1x1xf32>
      %100 = vector.extract %99[0, 0, 0] : f32 from vector<1x1x1xf32>
      %101 = arith.subf %95, %100 : f32
      %c0_70 = arith.constant 0 : index
      %c0_71 = arith.constant 0 : index
      %102 = vector.load %arg12[%c0_70, %c0_71] : memref<8x128xf32, #tpu.memory_space<vmem>>, vector<8x128xf32>
      %103 = vector.shape_cast %102 : vector<8x128xf32> to vector<1x8x128xf32>
      %cst_72 = arith.constant dense<0x7F800000> : vector<1xf32>
      %104 = vector.multi_reduction <minimumf>, %103, %cst_72 [1, 2] : vector<1x8x128xf32> to vector<1xf32>
      %105 = vector.shape_cast %104 : vector<1xf32> to vector<1x1x1xf32>
      %106 = vector.extract %105[0, 0, 0] : f32 from vector<1x1x1xf32>
      %107 = arith.subf %101, %106 : f32
      %cst_73 = arith.constant 5.000000e-01 : f32
      %108 = arith.mulf %cst_73, %107 : f32
      %cst_74 = arith.constant 6.000000e-01 : f32
      %109 = arith.addf %cst_74, %108 : f32
      %110 = vector.broadcast %109 : f32 to vector<1x1xf32>
      %c0_75 = arith.constant 0 : index
      %c0_76 = arith.constant 0 : index
      %111 = vector.load %arg6[%c0_75, %c0_76] : memref<1x1xf32, #tpu.memory_space<vmem>>, vector<1x1xf32>
      tpu.vector_store %arg6[%c0_75, %c0_76], %110 {strides = array<i32>} : memref<1x1xf32, #tpu.memory_space<vmem>>, vector<1x1xf32>,
    } else {
    }
    return
  }
  func.func @transform_0(%arg0: i32) -> (i32, i32) {
    %c0_i32 = arith.constant 0 : i32
    %c0_i32_0 = arith.constant 0 : i32
    return %arg0, %c0_i32 : i32, i32
  }
  func.func @transform_1(%arg0: i32) -> (i32, i32) {
    %c0_i32 = arith.constant 0 : i32
    %c0_i32_0 = arith.constant 0 : i32
    return %arg0, %c0_i32 : i32, i32
  }
  func.func @transform_2(%arg0: i32) -> (i32, i32) {
    %c0_i32 = arith.constant 0 : i32
    %c0_i32_0 = arith.constant 0 : i32
    return %arg0, %c0_i32 : i32, i32
  }
  func.func @transform_3(%arg0: i32) -> (i32, i32) {
    %c0_i32 = arith.constant 0 : i32
    %c0_i32_0 = arith.constant 0 : i32
    return %arg0, %c0_i32 : i32, i32
  }
  func.func @transform_4(%arg0: i32) -> (i32, i32) {
    %c0_i32 = arith.constant 0 : i32
    %c0_i32_0 = arith.constant 0 : i32
    return %arg0, %c0_i32 : i32, i32
  }
  func.func @transform_5(%arg0: i32) -> (i32, i32) {
    %c0_i32 = arith.constant 0 : i32
    %c0_i32_0 = arith.constant 0 : i32
    %c0_i32_1 = arith.constant 0 : i32
    return %c0_i32, %c0_i32_0 : i32, i32
  }
}

</mosaic_0001>

<bundles_post_ra>
// kernel: tpu_custom_call.1
= control target key start
LH: loop header
LB: loop body
LE: loop exit
PB: predicated region body
PF: predicated region fallthrough
CT: control target
= control target key end

     0   :  { %10 = vsyncpa [#allocation9], 0  ;;  %s714_s0 = inlined_call_operand.hbm [shape: s8[32,128], index: 0, kind: input, shape index: {}]   ;;  %s715_s1 = inlined_call_operand.hbm [shape: f32[32,128], index: 1, kind: input, shape index: {}]   ;;  %s716_s2 = inlined_call_operand.hbm [shape: f32[32,128], index: 2, kind: input, shape index: {}]   ;;  %s717_s3 = inlined_call_operand.hbm [shape: f32[32,128], index: 3, kind: input, shape index: {}]   ;;  %s718_s4 = inlined_call_operand.hbm [shape: f32[32,128], index: 4, kind: input, shape index: {}]   ;;  %s719_s5 = inlined_call_operand.hbm [shape: f32[1,1], index: 5, kind: output, shape index: {}]  }
   0x1   :  { %11 = vsyncpa [#allocation12], 0 }
   0x2   :  { %12 = vsyncpa [#allocation15], 0  ;;  %s29_s20 = sshll.u32 %s715_s1, 4  ;;  %s30_s20 = int_to_ptr.hbm [resolvable:$true] %s29_s20 }
   0x3   :  { %13 = vsyncpa [#allocation10], 0  ;;  %s536_s21 = smov [#allocation11]   ;;  %s55_s25 = sshll.u32 %s717_s3, 4  ;;  %s56_s25 = int_to_ptr.hbm [resolvable:$true] %s55_s25 }
   0x4   :  { %s31_s22 = sshll.u32 %s536_s21, 4  ;;  %s537_s26 = smov 128   ;;  %s32_s22 = int_to_ptr.vmem [resolvable:$true] %s31_s22 }
   0x5   :  { %s538_s27 = smov 8   ;;  %s539_s28 = smov [#allocation14]  }
   0x6   :  { %37 = dma.hbm_to_vmem [thread:$0]  %s30_s20, 512, %s32_s22, [#allocation12], %s537_s26, %s537_s26, %s538_s27  }
   0x7   :  { %s57_s29 = sshll.u32 %s539_s28, 4  ;;  %s19_s7 = sshll.u32 %s714_s0, 4  ;;  %s58_s29 = int_to_ptr.vmem [resolvable:$true] %s57_s29  ;;  %s20_s7 = int_to_ptr.hbm [resolvable:$true] %s19_s7 }
   0x8   :  { %63 = dma.hbm_to_vmem [thread:$0]  %s56_s25, 512, %s58_s29, [#allocation15], %s537_s26, %s537_s26, %s538_s27  }
   0x9   :  { %s42_s9 = sshll.u32 %s716_s2, 4  ;;  %s540_s10 = smov [#allocation8]   ;;  %s43_s9 = int_to_ptr.hbm [resolvable:$true] %s42_s9 }
   0xa   :  { %s21_s11 = sshll.u32 %s540_s10, 4  ;;  %s541_s3 = smov [#allocation13]   ;;  %s22_s11 = int_to_ptr.vmem [resolvable:$true] %s21_s11 }
   0xb   :  { %24 = dma.hbm_to_vmem [thread:$0]  %s20_s7, 128, %s22_s11, [#allocation9]  }
   0xc   :  { %s44_s12 = sshll.u32 %s541_s3, 4  ;;  %s68_s15 = sshll.u32 %s718_s4, 4  ;;  %s45_s12 = int_to_ptr.vmem [resolvable:$true] %s44_s12  ;;  %s69_s15 = int_to_ptr.hbm [resolvable:$true] %s68_s15 }
   0xd   :  { %50 = dma.hbm_to_vmem [thread:$0]  %s43_s9, 512, %s45_s12, [#allocation12], %s537_s26, %s537_s26, %s538_s27  }
   0xe   :  { %s542_s0 = smov [#allocation16]  }
   0xf   :  { %s70_s16 = sshll.u32 %s542_s0, 4  ;;  %s71_s16 = int_to_ptr.vmem [resolvable:$true] %s70_s16 }
  0x10   :  { %76 = dma.hbm_to_vmem [thread:$0]  %s69_s15, 512, %s71_s16, [#allocation15], %s537_s26, %s537_s26, %s538_s27  }
  0x11   :  { %528 = dma.done.wait [#allocation9], 128  }
  0x12   :  { %529 = vsyncadd [#allocation9], 4294967168 }
  0x13   :  { %530 = dma.done.wait [#allocation12], 1024  }
  0x14   :  { %531 = vsyncadd [#allocation12], 4294966272 }
  0x15   :  { %532 = dma.done.wait [#allocation15], 1024  }
  0x16   :  { %533 = vsyncadd [#allocation15], 4294966272  ;;  %v120_v0 = vld [vmem:[#allocation11] sm:$0xff]  ;;  %v121_v1 = vld [vmem:[#allocation11 + $0x8] sm:$0xff]  ;;  %s320_s28 = sshll.u32 %s719_s5, 4  ;;  %s543_s30 = smov [#allocation17]   ;;  %s321_s28 = int_to_ptr.hbm [resolvable:$true] %s320_s28 }
  0x17   :  { %v122_v2 = vld [vmem:[#allocation11 + $0x10] sm:$0xff]  ;;  %v123_v3 = vld [vmem:[#allocation11 + $0x18] sm:$0xff]  ;;  %v156_v4 = vld [vmem:[#allocation16] sm:$0xff]  ;;  %v124_v5 = vmul.f32 0.5, %v120_v0  ;;  %v125_v6 = vmul.f32 0.5, %v121_v1  ;;  %s318_s6 = sshll.u32 %s543_s30, 4  ;;  %s319_s6 = int_to_ptr.vmem [resolvable:$true] %s318_s6 }
  0x18   :  { %v126_v7 = vmul.f32 0.5, %v122_v2  ;;  %v157_v8 = vld [vmem:[#allocation16 + $0x8] sm:$0xff]  ;;  %v127_v9 = vmul.f32 0.5, %v123_v3  ;;  %v158_v10 = vld [vmem:[#allocation16 + $0x10] sm:$0xff]  ;;  %v159_v11 = vld [vmem:[#allocation16 + $0x18] sm:$0xff]  ;;  %v160_v12 = vmul.f32 0.5, %v156_v4 }
  0x19   :  { %352 = vtanh.f32 %v124_v5  ;;  %v161_v13 = vmul.f32 0.5, %v157_v8  ;;  %v132_v14 = vld [vmem:[#allocation13] sm:$0xff]  ;;  %v162_v15 = vmul.f32 0.5, %v158_v10  ;;  %v133_v16 = vld [vmem:[#allocation13 + $0x8] sm:$0xff]  ;;  %v589_v17 = vld [vmem:[#allocation8] sm:$0xff]  ;;  %v163_v18 = vmul.f32 0.5, %v159_v11 }
  0x1a   :  { %354 = vtanh.f32 %v125_v6  ;;  %v134_v19 = vld [vmem:[#allocation13 + $0x10] sm:$0xff]  ;;  %v135_v20 = vld [vmem:[#allocation13 + $0x18] sm:$0xff]  ;;  %v136_v21 = vmul.f32 0.5, %v132_v14  ;;  %v137_v22 = vmul.f32 0.5, %v133_v16  ;;  %v144_v23 = vld [vmem:[#allocation14] sm:$0xff]  ;;  %v108_v25 = vunpack.c.0.s8 %v589_v17 }
  0x1b   :  { %356 = vtanh.f32 %v126_v7  ;;  %v138_v26 = vmul.f32 0.5, %v134_v19  ;;  %v145_v27 = vld [vmem:[#allocation14 + $0x8] sm:$0xff]  ;;  %v109_v29 = vunpack.c.1.s8 %v589_v17  ;;  %v139_v30 = vmul.f32 0.5, %v135_v20  ;;  %v146_v31 = vld [vmem:[#allocation14 + $0x10] sm:$0xff]  ;;  %v147_v34 = vld [vmem:[#allocation14 + $0x18] sm:$0xff] }
  0x1c   :  { %358 = vtanh.f32 %v127_v9  ;;  %v110_v33 = vunpack.c.2.s8 %v589_v17  ;;  %v148_v35 = vmul.f32 0.5, %v144_v23  ;;  %v111_v37 = vunpack.c.3.s8 %v589_v17 }
  0x1d   :  { %360 = vtanh.f32 %v160_v12  ;;  %v149_v38 = vmul.f32 0.5, %v145_v27  ;;  %vm603_vm0 = vcmp.gt.s32.totalorder %v108_v25, 0  ;;  %v150_v41 = vmul.f32 0.5, %v146_v31 }
  0x1e   :  { %362 = vtanh.f32 %v161_v13  ;;  %vm607_vm1 = vcmp.gt.s32.totalorder %v109_v29, 0  ;;  %v151_v45 = vmul.f32 0.5, %v147_v34  ;;  %vm614_vm2 = vcmp.gt.s32.totalorder %v110_v33, 0 }
  0x1f   :  { %v591_v24 = vpop.eup %352  ;;  %364 = vtanh.f32 %v162_v15  ;;  %vm621_vm3 = vcmp.gt.s32.totalorder %v111_v37, 0  ;;  %vm637_vm4 = vcmp.eq.s32.totalorder %v108_v25, 0  ;;  %vm649_vm5 = vcmp.eq.s32.totalorder %v109_v29, 0 }
  0x20   :  { %v594_v28 = vpop.eup %354  ;;  %366 = vtanh.f32 %v163_v18  ;;  %vm653_vm6 = vcmp.eq.s32.totalorder %v110_v33, 0  ;;  %vm660_vm7 = vcmp.eq.s32.totalorder %v111_v37, 0  ;;  %vm311_vm8 = vcmask 0  }
  0x21   :  { %v597_v32 = vpop.eup %356  ;;  %368 = vtanh.f32 %v136_v21 }
  0x22   :  { %v600_v36 = vpop.eup %358  ;;  %370 = vtanh.f32 %v137_v22 }
  0x23   :  { %v361_v39 = vpop.eup %360  ;;  %372 = vtanh.f32 %v138_v26 }
  0x24   :  { %v363_v42 = vpop.eup %362  ;;  %v612_v44 = vsub.f32 %v361_v39, %v591_v24  ;;  %374 = vtanh.f32 %v139_v30 }
  0x25   :  { %v365_v46 = vpop.eup %364  ;;  %v619_v48 = vsub.f32 %v363_v42, %v594_v28  ;;  %376 = vtanh.f32 %v148_v35 }
  0x26   :  { %v367_v49 = vpop.eup %366  ;;  %v626_v51 = vsub.f32 %v365_v46, %v597_v32  ;;  %v200_v52 = vsel %vm603_vm0, %v612_v44, -inf  ;;  %378 = vtanh.f32 %v149_v38  ;;  %v230_v42 = vsel %vm637_vm4, %v612_v44, inf }
  0x27   :  { %v369_v53 = vpop.eup %368  ;;  %v632_v54 = vsub.f32 %v367_v49, %v600_v36  ;;  %v201_v55 = vsel %vm607_vm1, %v619_v48, -inf  ;;  %380 = vtanh.f32 %v150_v41  ;;  %v231_v43 = vsel %vm649_vm5, %v619_v48, inf }
  0x28   :  { %v371_v57 = vpop.eup %370  ;;  %v202_v58 = vsel %vm614_vm2, %v626_v51, -inf  ;;  %v204_v59 = vmax.f32 %v200_v52, %v201_v55  ;;  %v168_v60 = vsub.f32 %v369_v53, %v591_v24  ;;  %382 = vtanh.f32 %v151_v45 }
  0x29   :  { %v373_v61 = vpop.eup %372  ;;  %v203_v62 = vsel %vm621_vm3, %v632_v54, -inf  ;;  %v169_v63 = vsub.f32 %v371_v57, %v594_v28  ;;  %v232_v45 = vsel %vm653_vm6, %v626_v51, inf  ;;  %v233_v46 = vsel %vm660_vm7, %v632_v54, inf }
  0x2a   :  { %v375_v2 = vpop.eup %374  ;;  %v205_v3 = vmax.f32 %v202_v58, %v203_v62  ;;  %v170_v4 = vsub.f32 %v373_v61, %v597_v32  ;;  %v180_v5 = vsel %vm603_vm0, %v168_v60, -inf  ;;  %v210_v10 = vsel %vm637_vm4, %v168_v60, inf }
  0x2b   :  { %v377_v7 = vpop.eup %376  ;;  %v171_v8 = vsub.f32 %v375_v2, %v600_v36  ;;  %v181_v9 = vsel %vm607_vm1, %v169_v63, -inf  ;;  %v211_v11 = vsel %vm649_vm5, %v169_v63, inf  ;;  %v234_v50 = vmin.f32 %v230_v42, %v231_v43 }
  0x2c   :  { %v379_v12 = vpop.eup %378  ;;  %v206_v13 = vmax.f32 %v204_v59, %v205_v3  ;;  %v182_v14 = vsel %vm614_vm2, %v170_v4, -inf  ;;  %v184_v15 = vmax.f32 %v180_v5, %v181_v9  ;;  %v172_v16 = vsub.f32 %v377_v7, %v591_v24 }
  0x2d   :  { %v381_v17 = vpop.eup %380  ;;  %v183_v18 = vsel %vm621_vm3, %v171_v8, -inf  ;;  %v173_v19 = vsub.f32 %v379_v12, %v594_v28  ;;  %v212_v20 = vsel %vm653_vm6, %v170_v4, inf  ;;  %v213_v21 = vsel %vm660_vm7, %v171_v8, inf }
  0x2e   :  { %v383_v22 = vpop.eup %382  ;;  %265 = vmax.xlane.f32.xlu1 %v206_v13  ;;  %v185_v23 = vmax.f32 %v182_v14, %v183_v18  ;;  %v174_v25 = vsub.f32 %v381_v17, %v597_v32  ;;  %v220_v24 = vsel %vm637_vm4, %v172_v16, inf  ;;  %v214_v26 = vmin.f32 %v210_v10, %v211_v11 }
  0x2f   :  { %v175_v27 = vsub.f32 %v383_v22, %v600_v36  ;;  %v221_v28 = vsel %vm649_vm5, %v173_v19, inf  ;;  %v215_v29 = vmin.f32 %v212_v20, %v213_v21  ;;  %v190_v30 = vsel %vm603_vm0, %v172_v16, -inf }
  0x30   :  { %v186_v31 = vmax.f32 %v184_v15, %v185_v23  ;;  %v222_v33 = vsel %vm653_vm6, %v174_v25, inf  ;;  %v224_v34 = vmin.f32 %v220_v24, %v221_v28  ;;  %v191_v32 = vsel %vm607_vm1, %v173_v19, -inf }
  0x31   :  { %v223_v35 = vsel %vm660_vm7, %v175_v27, inf  ;;  %v192_v36 = vsel %vm614_vm2, %v174_v25, -inf  ;;  %v193_v37 = vsel %vm621_vm3, %v175_v27, -inf  ;;  %v216_v39 = vmin.f32 %v214_v26, %v215_v29 }
  0x32   :  { %244 = vmax.xlane.f32.xlu0 %v186_v31  ;;  %v225_v38 = vmin.f32 %v222_v33, %v223_v35  ;;  %v194_v40 = vmax.f32 %v190_v30, %v191_v32  ;;  %v195_v41 = vmax.f32 %v192_v36, %v193_v37  ;;  %v235_v52 = vmin.f32 %v232_v45, %v233_v46 }
  0x34   :  { %v226_v47 = vmin.f32 %v224_v34, %v225_v38  ;;  %v196_v49 = vmax.f32 %v194_v40, %v195_v41  ;;  %v236_v44 = vmin.f32 %v234_v50, %v235_v52 }
  0x36   :  { %287 = vmin.xlane.f32.xlu2 %v226_v47  ;;  %276 = vmin.xlane.f32.xlu1 %v216_v39 }
  0x3a   :  { %254 = vmax.xlane.f32.xlu0 %v196_v49 }
  0x3e   :  { %298 = vmin.xlane.f32.xlu2 %v236_v44 }
  0xa1   :  { %v266_v53 = vpop.xlane.xlu1 %265 }
  0xa2   :  { %v267_v55 = vrot.slane %v266_v53, 4 }
  0xa4   :  { %v268_v58 = vmax.f32 %v266_v53, %v267_v55 }
  0xa5   :  { %v245_v48 = vpop.xlane.xlu0 %244 }
  0xa6   :  { %v246_v56 = vrot.slane %v245_v48, 4  ;;  %v269_v1 = vrot.slane %v268_v58, 2 }
  0xa8   :  { %v247_v57 = vmax.f32 %v245_v48, %v246_v56  ;;  %v270_v11 = vmax.f32 %v268_v58, %v269_v1 }
  0xa9   :  { %v288_v51 = vpop.xlane.xlu2 %287  ;;  %v277_v59 = vpop.xlane.xlu1 %276 }
  0xaa   :  { %v248_v60 = vrot.slane %v247_v57, 2  ;;  %v289_v61 = vrot.slane %v288_v51, 4  ;;  %v278_v54 = vrot.slane %v277_v59, 4  ;;  %v271_v18 = vrot.slane %v270_v11, 1 }
  0xac   :  { %v290_v62 = vmin.f32 %v288_v51, %v289_v61  ;;  %v279_v63 = vmin.f32 %v277_v59, %v278_v54  ;;  %v249_v0 = vmax.f32 %v247_v57, %v248_v60  ;;  %v272_v24 = vmax.f32 %v270_v11, %v271_v18 }
  0xad   :  { %v255_v2 = vpop.xlane.xlu0 %254 }
  0xae   :  { %v280_v3 = vrot.slane %v279_v63, 2  ;;  %v256_v4 = vrot.slane %v255_v2, 4  ;;  %v250_v5 = vrot.slane %v249_v0, 1  ;;  %v291_v6 = vrot.slane %v290_v62, 2 }
  0xb0   :  { %v281_v7 = vmin.f32 %v279_v63, %v280_v3  ;;  %v257_v8 = vmax.f32 %v255_v2, %v256_v4  ;;  %v251_v9 = vmax.f32 %v249_v0, %v250_v5  ;;  %v292_v14 = vmin.f32 %v290_v62, %v291_v6 }
  0xb1   :  { %v299_v10 = vpop.xlane.xlu2 %298 }
  0xb2   :  { %v258_v12 = vrot.slane %v257_v8, 2  ;;  %v300_v13 = vrot.slane %v299_v10, 4  ;;  %332 = vpush %v251_v9  ;;  %v282_v17 = vrot.slane %v281_v7, 1  ;;  %v293_v21 = vrot.slane %v292_v14, 1 }
  0xb4   :  { %v259_v15 = vmax.f32 %v257_v8, %v258_v12  ;;  %v301_v16 = vmin.f32 %v299_v10, %v300_v13  ;;  %v283_v25 = vmin.f32 %v281_v7, %v282_v17  ;;  %v294_v27 = vmin.f32 %v292_v14, %v293_v21 }
  0xb6   :  { %v302_v19 = vrot.slane %v301_v16, 2  ;;  %v260_v20 = vrot.slane %v259_v15, 1 }
  0xb8   :  { %v303_v22 = vmin.f32 %v301_v16, %v302_v19  ;;  %v261_v23 = vmax.f32 %v259_v15, %v260_v20 }
  0xba   :  { %334 = vpush %v261_v23  ;;  %v304_v26 = vrot.slane %v303_v22, 1 }
  0xbb   :  { %336 = vpush %v272_v24 }
  0xbc   :  { %338 = vpush %v283_v25  ;;  %v305_v28 = vmin.f32 %v303_v22, %v304_v26 }
  0xbd   :  { %340 = vpush %v294_v27 }
  0xbe   :  { %342 = vpush %v305_v28 }
  0xe3   :  { %s333_s2 = spop %332 }
  0xeb   :  { %s335_s4 = spop %334 }
  0xec   :  { %s263_s17 = sadd.f32 %s335_s4, %s333_s2  ;;  %s337_s18 = spop %336 }
  0xed   :  { %s339_s20 = spop %338 }
  0xee   :  { %s274_s19 = sadd.f32 %s337_s18, %s263_s17  ;;  %s341_s22 = spop %340 }
  0xef   :  { %s343_s24 = spop %342 }
  0xf0   :  { %s285_s21 = ssub.f32 %s274_s19, %s339_s20 }
  0xf2   :  { %s296_s23 = ssub.f32 %s285_s21, %s341_s22 }
  0xf4   :  { %s307_s25 = ssub.f32 %s296_s23, %s343_s24 }
  0xf6   :  { %s308_s29 = smul.f32 0.5, %s307_s25 }
  0xf8   :  { %s309_s7 = sadd.f32 0.6, %s308_s29 }
  0xfa   :  { %v310_v29 = vstv %s309_s7 }
  0xfb   :  { %312 = vst.msk [vmem:[#allocation17] sm:$0x1] %vm311_vm8, %v310_v29 }
  0xfc   :  { %323 = dma.vmem_to_hbm [thread:$0]  %s319_s6, 16, %s321_s28, [#allocation10]  }
  0xfd   :  { %534 = dma.done.wait [#allocation10], 16  }
  0xfe   :  { %535 = vsyncadd [#allocation10], 4294967280 }
  0xff   :  { %328 = vsyncpa [#allocation9], 1 }
 0x100   :  { %329 = vsyncpa [#allocation12], 1 }
 0x101   :  { %330 = vsyncpa [#allocation15], 1 }
 0x102   :  { %331 = vsyncpa [#allocation10], 1 }

</bundles_post_ra>
